<compile_context>
chip_gen: v5e
topology: v5e:2x2
jax: 0.10.0
libtpu: 0.0.40
codegen_flags: <defaults>
</compile_context>

<pallas_src>
import functools

import jax
import jax.numpy as jnp
from jax.experimental import pallas as pl
from jax.experimental.pallas import tpu as pltpu


# ----------------------------------------------------------------------------
# Kernel 1: hoisted, fully parallel input projection  gx = X @ W_x + b
# (one big MXU matmul over all timesteps, bias folded in; "parallel" M grid)
# ----------------------------------------------------------------------------
def _projection_kernel(x_ref, wx_ref, b_ref, gx_ref):
    gx_ref[...] = (
        jnp.dot(x_ref[...], wx_ref[...], preferred_element_type=jnp.float32)
        + b_ref[...]
    ).astype(gx_ref.dtype)


def _input_projection(x2d, W_x, b, *, tm):
    M, D = x2d.shape
    G = W_x.shape[1]
    assert M % tm == 0, "demo wrapper requires tm | T*B"
    # TODO(synk): at real shapes tile K (128 on v5e, 256 on v6e/v7x) and use
    # M-tiles >= 512 rows with bf16 operands to keep the MXU near peak.
    return pl.pallas_call(
        _projection_kernel,
        grid=(M // tm,),
        in_specs=[
            pl.BlockSpec((tm, D), lambda i: (i, 0)),
            pl.BlockSpec((D, G), lambda i: (0, 0)),
            pl.BlockSpec((1, G), lambda i: (0, 0)),
        ],
        out_specs=pl.BlockSpec((tm, G), lambda i: (i, 0)),
        out_shape=jax.ShapeDtypeStruct((M, G), jnp.float32),
        compiler_params=pltpu.CompilerParams(
            dimension_semantics=("parallel",)),
    )(x2d, W_x, b)


# ----------------------------------------------------------------------------
# Kernel 2: serial recurrence, streamed over time tiles.
#   gx tile:  (Tb*B, 4H)   streamed in
#   out tile: (Tb, B, H)   streamed out
#   h/c:      (B, H) VMEM scratch, carried across grid steps
# ----------------------------------------------------------------------------
def _recurrence_kernel(gx_ref, wh_ref, out_ref, hT_ref, cT_ref, h_sc, c_sc):
    step_idx = pl.program_id(0)
    n_steps = pl.num_programs(0)
    Tb, B, H = out_ref.shape

    @pl.when(step_idx == 0)
    def _():
        h_sc[...] = jnp.zeros_like(h_sc)
        c_sc[...] = jnp.zeros_like(c_sc)

    # Hoist loop invariants (JAX does not CSE broadcast_in_dim).
    wh = wh_ref[...]
    lane = jax.lax.broadcasted_iota(jnp.int32, (B, 4 * H), 1)
    sig_mask = lane < 3 * H            # gates [i, f, o] sigmoid, [c~] tanh
    half = jnp.where(sig_mask, jnp.float32(0.5), jnp.float32(1.0))
    post_add = jnp.where(sig_mask, jnp.float32(0.5), jnp.float32(0.0))

    def step(t, carry):
        h, c = carry
        row = pl.multiple_of(t * B, B)      # sublane-aligned slice start
        gates = gx_ref[pl.ds(row, B), :] + jnp.dot(
            h, wh, preferred_element_type=jnp.float32)
        # Single EUP pass: sigmoid(x) = 0.5 * tanh(x/2) + 0.5.
        t_act = jnp.tanh(gates * half)
        act = t_act * half + post_add
        i_g = act[:, 0 * H:1 * H]
        f_g = act[:, 1 * H:2 * H]
        o_g = act[:, 2 * H:3 * H]
        c_tilde = act[:, 3 * H:4 * H]
        c_new = f_g * c + i_g * c_tilde
        h_new = o_g * jnp.tanh(c_new)
        out_ref[t] = h_new.astype(out_ref.dtype)
        return h_new, c_new

    # Full unroll only within the small time tile (the grid bounds code size).
    h_fin, c_fin = jax.lax.fori_loop(
        0, Tb, step, (h_sc[...], c_sc[...]), unroll=True)
    h_sc[...] = h_fin
    c_sc[...] = c_fin

    @pl.when(step_idx == n_steps - 1)
    def _():
        hT_ref[...] = h_fin.astype(hT_ref.dtype)
        cT_ref[...] = c_fin.astype(cT_ref.dtype)


# ----------------------------------------------------------------------------
# Wrapper
# ----------------------------------------------------------------------------
@functools.partial(jax.jit, static_argnames=("time_block",))
def lstm_scratch_forward(inputs, W_x, W_h, b, time_block=4):
    """inputs: (T, B, D). Returns (outputs (T, B, H), (H_final, C_final)).

    Gate weights are concatenated as W_x: (D, 4H), W_h: (H, 4H), b: (1, 4H)
    in order [i, f, o, c], matching the reference module's four gate triples.
    NOTE: the reference initializes H/C with inputs.shape[0] rows when H_C is
    None, which only type-checks when T == B; we reproduce those semantics.
    """
    T, B, D = inputs.shape
    H = W_h.shape[0]
    dtype = inputs.dtype

    Tb = min(time_block, T)
    assert T % Tb == 0, "demo wrapper requires time_block | T"

    # Hoisted, fully-parallel projection for ALL timesteps (bias folded in).
    x2d = inputs.reshape(T * B, D).astype(jnp.float32)
    gx = _input_projection(
        x2d, W_x.astype(jnp.float32), b.astype(jnp.float32),
        tm=min(T * B, 512))

    outputs, h_final, c_final = pl.pallas_call(
        _recurrence_kernel,
        grid=(T // Tb,),
        in_specs=[
            # gx tiles stream sequentially in t.
            # TODO(synk): pipeline_mode=pl.Buffered(3) to deepen the pipeline.
            pl.BlockSpec((Tb * B, 4 * H), lambda i: (i, 0)),
            # W_h resident across the whole recurrence.
            pl.BlockSpec((H, 4 * H), lambda i: (0, 0)),
        ],
        out_specs=(
            pl.BlockSpec((Tb, B, H), lambda i: (i, 0, 0)),   # per-step hidden
            pl.BlockSpec((B, H), lambda i: (0, 0)),          # final hidden
            pl.BlockSpec((B, H), lambda i: (0, 0)),          # final cell
        ),
        out_shape=(
            jax.ShapeDtypeStruct((T, B, H), dtype),
            jax.ShapeDtypeStruct((B, H), dtype),
            jax.ShapeDtypeStruct((B, H), dtype),
        ),
        scratch_shapes=[
            pltpu.VMEM((B, H), jnp.float32),   # h carry
            pltpu.VMEM((B, H), jnp.float32),   # c carry
        ],
        compiler_params=pltpu.CompilerParams(
            dimension_semantics=("arbitrary",)),
    )(gx, W_h.astype(jnp.float32))

    return outputs, (h_final, c_final)


# ----------------------------------------------------------------------------
# Pure-JAX reference mirroring the PyTorch loop (for sanity checking).
# ----------------------------------------------------------------------------
def _reference_lstm(inputs, W_x, W_h, b):
    T, B, D = inputs.shape
    H = W_h.shape[0]
    h = jnp.zeros((B, H), jnp.float32)
    c = jnp.zeros((B, H), jnp.float32)
    outs = []
    for t in range(T):
        gates = inputs[t] @ W_x + h @ W_h + b
        i_g = jax.nn.sigmoid(gates[:, 0 * H:1 * H])
        f_g = jax.nn.sigmoid(gates[:, 1 * H:2 * H])
        o_g = jax.nn.sigmoid(gates[:, 2 * H:3 * H])
        c_t = jnp.tanh(gates[:, 3 * H:4 * H])
        c = f_g * c + i_g * c_t
        h = o_g * jnp.tanh(c)
        outs.append(h)
    return jnp.stack(outs), (h, c)


if __name__ == "__main__":
    # Small, deterministic setup.  T == B so the reference module's
    # zeros((inputs.shape[0], H)) init is shape-consistent.
    T, B, D, H = 8, 8, 32, 32
    sigma = 0.01
    key = jax.random.PRNGKey(0)
    k_in, k_xi, k_hi, k_xf, k_hf, k_xo, k_ho, k_xc, k_hc = jax.random.split(key, 9)

    inputs = jax.random.normal(k_in, (T, B, D), jnp.float32)

    # Parameters: randn * sigma for weights, zeros for biases (per __init__).
    W_xi = jax.random.normal(k_xi, (D, H), jnp.float32) * sigma
    W_hi = jax.random.normal(k_hi, (H, H), jnp.float32) * sigma
    W_xf = jax.random.normal(k_xf, (D, H), jnp.float32) * sigma
    W_hf = jax.random.normal(k_hf, (H, H), jnp.float32) * sigma
    W_xo = jax.random.normal(k_xo, (D, H), jnp.float32) * sigma
    W_ho = jax.random.normal(k_ho, (H, H), jnp.float32) * sigma
    W_xc = jax.random.normal(k_xc, (D, H), jnp.float32) * sigma
    W_hc = jax.random.normal(k_hc, (H, H), jnp.float32) * sigma
    b_i = jnp.zeros((H,), jnp.float32)
    b_f = jnp.zeros((H,), jnp.float32)
    b_o = jnp.zeros((H,), jnp.float32)
    b_c = jnp.zeros((H,), jnp.float32)

    # Concatenate gates [i, f, o, c] for fused matmuls.
    W_x = jnp.concatenate([W_xi, W_xf, W_xo, W_xc], axis=1)     # (D, 4H)
    W_h = jnp.concatenate([W_hi, W_hf, W_ho, W_hc], axis=1)     # (H, 4H)
    b = jnp.concatenate([b_i, b_f, b_o, b_c])[None, :]          # (1, 4H)

    outputs, (h_final, c_final) = lstm_scratch_forward(inputs, W_x, W_h, b)
    jax.block_until_ready((outputs, h_final, c_final))

    # Sanity check against the pure-JAX loop reference.
    ref_outs, (ref_h, ref_c) = _reference_lstm(inputs, W_x, W_h, b)
    assert jnp.allclose(outputs, ref_outs, atol=1e-5, rtol=1e-5)
    assert jnp.allclose(h_final, ref_h, atol=1e-5, rtol=1e-5)
    assert jnp.allclose(c_final, ref_c, atol=1e-5, rtol=1e-5)

    print("KERNEL_OK")
</pallas_src>

<mosaic_0001>
module attributes {stable_mosaic.version = 11 : i64} {
  func.func @_projection_kernel(%arg0: i32, %arg1: memref<64x32xf32, #tpu.memory_space<vmem>>, %arg2: memref<32x128xf32, #tpu.memory_space<vmem>>, %arg3: memref<1x128xf32, #tpu.memory_space<vmem>>, %arg4: memref<64x128xf32, #tpu.memory_space<vmem>>) attributes {dimension_semantics = [#tpu.dimension_semantics<parallel>], iteration_bounds = array<i64: 1>, scalar_prefetch = 0 : i64, scratch_operands = 0 : i64, tpu.core_type = #tpu.core_type<tc>, window_params = [{transform_indices = @transform_0, window_bounds = array<i64: 64, 32>}, {pipeline_mode = #tpu.pipeline_mode<synchronous>, transform_indices = @transform_1, window_bounds = array<i64: 32, 128>}, {pipeline_mode = #tpu.pipeline_mode<synchronous>, transform_indices = @transform_2, window_bounds = array<i64: 1, 128>}, {transform_indices = @transform_3, window_bounds = array<i64: 64, 128>}]} {
    %c0 = arith.constant 0 : index
    %c0_0 = arith.constant 0 : index
    %0 = vector.load %arg1[%c0, %c0_0] : memref<64x32xf32, #tpu.memory_space<vmem>>, vector<64x32xf32>
    %c0_1 = arith.constant 0 : index
    %c0_2 = arith.constant 0 : index
    %1 = vector.load %arg2[%c0_1, %c0_2] : memref<32x128xf32, #tpu.memory_space<vmem>>, vector<32x128xf32>
    %cst = arith.constant dense<0.000000e+00> : vector<64x128xf32>
    %2 = tpu.matmul %0, %1, %cst {dimension_numbers = #tpu.dot_dimension_numbers<[1], [0], [0], [1], [0, 0, 1, 1], [], []>} : vector<64x32xf32>, vector<32x128xf32>, vector<64x128xf32> -> vector<64x128xf32>
    %c0_3 = arith.constant 0 : index
    %c0_4 = arith.constant 0 : index
    %3 = vector.load %arg3[%c0_3, %c0_4] : memref<1x128xf32, #tpu.memory_space<vmem>>, vector<1x128xf32>
    %4 = vector.broadcast %3 : vector<1x128xf32> to vector<64x128xf32>
    %5 = arith.addf %2, %4 : vector<64x128xf32>
    %c0_5 = arith.constant 0 : index
    %c0_6 = arith.constant 0 : index
    %6 = vector.load %arg4[%c0_5, %c0_6] : memref<64x128xf32, #tpu.memory_space<vmem>>, vector<64x128xf32>
    tpu.vector_store %arg4[%c0_5, %c0_6], %5 {strides = array<i32>} : memref<64x128xf32, #tpu.memory_space<vmem>>, vector<64x128xf32>,
    return
  }
  func.func @transform_0(%arg0: i32) -> (i32, i32) {
    %c0_i32 = arith.constant 0 : i32
    %c0_i32_0 = arith.constant 0 : i32
    return %arg0, %c0_i32 : i32, i32
  }
  func.func @transform_1(%arg0: i32) -> (i32, i32) {
    %c0_i32 = arith.constant 0 : i32
    %c0_i32_0 = arith.constant 0 : i32
    %c0_i32_1 = arith.constant 0 : i32
    return %c0_i32, %c0_i32_0 : i32, i32
  }
  func.func @transform_2(%arg0: i32) -> (i32, i32) {
    %c0_i32 = arith.constant 0 : i32
    %c0_i32_0 = arith.constant 0 : i32
    %c0_i32_1 = arith.constant 0 : i32
    return %c0_i32, %c0_i32_0 : i32, i32
  }
  func.func @transform_3(%arg0: i32) -> (i32, i32) {
    %c0_i32 = arith.constant 0 : i32
    %c0_i32_0 = arith.constant 0 : i32
    return %arg0, %c0_i32 : i32, i32
  }
}

module attributes {stable_mosaic.version = 11 : i64} {
  func.func @_recurrence_kernel(%arg0: i32, %arg1: memref<32x128xf32, #tpu.memory_space<vmem>>, %arg2: memref<32x128xf32, #tpu.memory_space<vmem>>, %arg3: memref<4x8x32xf32, #tpu.memory_space<vmem>>, %arg4: memref<8x32xf32, #tpu.memory_space<vmem>>, %arg5: memref<8x32xf32, #tpu.memory_space<vmem>>, %arg6: memref<8x32xf32, #tpu.memory_space<vmem>>, %arg7: memref<8x32xf32, #tpu.memory_space<vmem>>) attributes {dimension_semantics = [#tpu.dimension_semantics<arbitrary>], iteration_bounds = array<i64: 2>, scalar_prefetch = 0 : i64, scratch_operands = 2 : i64, tpu.core_type = #tpu.core_type<tc>, window_params = [{transform_indices = @transform_0, window_bounds = array<i64: 32, 128>}, {pipeline_mode = #tpu.pipeline_mode<synchronous>, transform_indices = @transform_1, window_bounds = array<i64: 32, 128>}, {transform_indices = @transform_2, window_bounds = array<i64: 4, 8, 32>}, {pipeline_mode = #tpu.pipeline_mode<synchronous>, transform_indices = @transform_3, window_bounds = array<i64: 8, 32>}, {pipeline_mode = #tpu.pipeline_mode<synchronous>, transform_indices = @transform_4, window_bounds = array<i64: 8, 32>}]} {
    %c0_i32 = arith.constant 0 : i32
    %0 = arith.cmpi eq, %arg0, %c0_i32 : i32
    %1 = arith.extui %0 : i1 to i32
    %c0_i32_0 = arith.constant 0 : i32
    %2 = arith.cmpi ne, %1, %c0_i32_0 : i32
    scf.if %2 {
      %cst_35 = arith.constant 0.000000e+00 : f32
      %112 = vector.broadcast %cst_35 : f32 to vector<8x32xf32>
      %c0_36 = arith.constant 0 : index
      %c0_37 = arith.constant 0 : index
      %113 = vector.load %arg6[%c0_36, %c0_37] : memref<8x32xf32, #tpu.memory_space<vmem>>, vector<8x32xf32>
      tpu.vector_store %arg6[%c0_36, %c0_37], %112 {strides = array<i32>} : memref<8x32xf32, #tpu.memory_space<vmem>>, vector<8x32xf32>,
      %cst_38 = arith.constant 0.000000e+00 : f32
      %114 = vector.broadcast %cst_38 : f32 to vector<8x32xf32>
      %c0_39 = arith.constant 0 : index
      %c0_40 = arith.constant 0 : index
      %115 = vector.load %arg7[%c0_39, %c0_40] : memref<8x32xf32, #tpu.memory_space<vmem>>, vector<8x32xf32>
      tpu.vector_store %arg7[%c0_39, %c0_40], %114 {strides = array<i32>} : memref<8x32xf32, #tpu.memory_space<vmem>>, vector<8x32xf32>,
    } else {
    }
    %c0 = arith.constant 0 : index
    %c0_1 = arith.constant 0 : index
    %3 = vector.load %arg2[%c0, %c0_1] : memref<32x128xf32, #tpu.memory_space<vmem>>, vector<32x128xf32>
    %4 = tpu.iota {dimensions = array<i32: 1>} : vector<8x128xi32>
    %c96_i32 = arith.constant 96 : i32
    %5 = vector.broadcast %c96_i32 : i32 to vector<8x128xi32>
    %6 = arith.cmpi slt, %4, %5 : vector<8x128xi32>
    %cst = arith.constant 5.000000e-01 : f32
    %cst_2 = arith.constant 1.000000e+00 : f32
    %7 = vector.broadcast %cst : f32 to vector<8x128xf32>
    %8 = vector.broadcast %cst_2 : f32 to vector<8x128xf32>
    %9 = arith.select %6, %7, %8 : vector<8x128xi1>, vector<8x128xf32>
    %cst_3 = arith.constant 5.000000e-01 : f32
    %cst_4 = arith.constant 0.000000e+00 : f32
    %10 = vector.broadcast %cst_3 : f32 to vector<8x128xf32>
    %11 = vector.broadcast %cst_4 : f32 to vector<8x128xf32>
    %12 = arith.select %6, %10, %11 : vector<8x128xi1>, vector<8x128xf32>
    %c0_5 = arith.constant 0 : index
    %c0_6 = arith.constant 0 : index
    %13 = vector.load %arg6[%c0_5, %c0_6] : memref<8x32xf32, #tpu.memory_space<vmem>>, vector<8x32xf32>
    %c0_7 = arith.constant 0 : index
    %c0_8 = arith.constant 0 : index
    %14 = vector.load %arg7[%c0_7, %c0_8] : memref<8x32xf32, #tpu.memory_space<vmem>>, vector<8x32xf32>
    %c0_i32_9 = arith.constant 0 : i32
    %c8_i32 = arith.constant 8 : i32
    %15 = arith.muli %c0_i32_9, %c8_i32 : i32
    %16 = tpu.assume_multiple %15, 8 : i32
    %17 = arith.index_cast %16 : i32 to index
    %c0_10 = arith.constant 0 : index
    %18 = vector.load %arg1[%17, %c0_10] : memref<32x128xf32, #tpu.memory_space<vmem>>, vector<8x128xf32>
    %cst_11 = arith.constant dense<0.000000e+00> : vector<8x128xf32>
    %19 = tpu.matmul %13, %3, %cst_11 {dimension_numbers = #tpu.dot_dimension_numbers<[1], [0], [0], [1], [0, 0, 1, 1], [], []>} : vector<8x32xf32>, vector<32x128xf32>, vector<8x128xf32> -> vector<8x128xf32>
    %20 = arith.addf %18, %19 : vector<8x128xf32>
    %21 = arith.mulf %20, %9 : vector<8x128xf32>
    %22 = math.tanh %21 : vector<8x128xf32>
    %23 = arith.mulf %22, %9 : vector<8x128xf32>
    %24 = arith.addf %23, %12 : vector<8x128xf32>
    %25 = vector.extract_strided_slice %24 {offsets = [0, 0], sizes = [8, 32], strides = [1, 1]} : vector<8x128xf32> to vector<8x32xf32>
    %26 = vector.extract_strided_slice %24 {offsets = [0, 32], sizes = [8, 32], strides = [1, 1]} : vector<8x128xf32> to vector<8x32xf32>
    %27 = vector.extract_strided_slice %24 {offsets = [0, 64], sizes = [8, 32], strides = [1, 1]} : vector<8x128xf32> to vector<8x32xf32>
    %28 = vector.extract_strided_slice %24 {offsets = [0, 96], sizes = [8, 32], strides = [1, 1]} : vector<8x128xf32> to vector<8x32xf32>
    %29 = arith.mulf %26, %14 : vector<8x32xf32>
    %30 = arith.mulf %25, %28 : vector<8x32xf32>
    %31 = arith.addf %29, %30 : vector<8x32xf32>
    %32 = math.tanh %31 : vector<8x32xf32>
    %33 = arith.mulf %27, %32 : vector<8x32xf32>
    %34 = arith.index_cast %c0_i32_9 : i32 to index
    %c0_12 = arith.constant 0 : index
    %c0_13 = arith.constant 0 : index
    %35 = vector.load %arg3[%34, %c0_12, %c0_13] : memref<4x8x32xf32, #tpu.memory_space<vmem>>, vector<1x8x32xf32>
    %36 = vector.shape_cast %35 : vector<1x8x32xf32> to vector<8x32xf32>
    %37 = vector.shape_cast %33 : vector<8x32xf32> to vector<1x8x32xf32>
    tpu.vector_store %arg3[%34, %c0_12, %c0_13], %37 {strides = array<i32>} : memref<4x8x32xf32, #tpu.memory_space<vmem>>, vector<1x8x32xf32>,
    %c1_i32 = arith.constant 1 : i32
    %c8_i32_14 = arith.constant 8 : i32
    %38 = arith.muli %c1_i32, %c8_i32_14 : i32
    %39 = tpu.assume_multiple %38, 8 : i32
    %40 = arith.index_cast %39 : i32 to index
    %c0_15 = arith.constant 0 : index
    %41 = vector.load %arg1[%40, %c0_15] : memref<32x128xf32, #tpu.memory_space<vmem>>, vector<8x128xf32>
    %cst_16 = arith.constant dense<0.000000e+00> : vector<8x128xf32>
    %42 = tpu.matmul %33, %3, %cst_16 {dimension_numbers = #tpu.dot_dimension_numbers<[1], [0], [0], [1], [0, 0, 1, 1], [], []>} : vector<8x32xf32>, vector<32x128xf32>, vector<8x128xf32> -> vector<8x128xf32>
    %43 = arith.addf %41, %42 : vector<8x128xf32>
    %44 = arith.mulf %43, %9 : vector<8x128xf32>
    %45 = math.tanh %44 : vector<8x128xf32>
    %46 = arith.mulf %45, %9 : vector<8x128xf32>
    %47 = arith.addf %46, %12 : vector<8x128xf32>
    %48 = vector.extract_strided_slice %47 {offsets = [0, 0], sizes = [8, 32], strides = [1, 1]} : vector<8x128xf32> to vector<8x32xf32>
    %49 = vector.extract_strided_slice %47 {offsets = [0, 32], sizes = [8, 32], strides = [1, 1]} : vector<8x128xf32> to vector<8x32xf32>
    %50 = vector.extract_strided_slice %47 {offsets = [0, 64], sizes = [8, 32], strides = [1, 1]} : vector<8x128xf32> to vector<8x32xf32>
    %51 = vector.extract_strided_slice %47 {offsets = [0, 96], sizes = [8, 32], strides = [1, 1]} : vector<8x128xf32> to vector<8x32xf32>
    %52 = arith.mulf %49, %31 : vector<8x32xf32>
    %53 = arith.mulf %48, %51 : vector<8x32xf32>
    %54 = arith.addf %52, %53 : vector<8x32xf32>
    %55 = math.tanh %54 : vector<8x32xf32>
    %56 = arith.mulf %50, %55 : vector<8x32xf32>
    %57 = arith.index_cast %c1_i32 : i32 to index
    %c0_17 = arith.constant 0 : index
    %c0_18 = arith.constant 0 : index
    %58 = vector.load %arg3[%57, %c0_17, %c0_18] : memref<4x8x32xf32, #tpu.memory_space<vmem>>, vector<1x8x32xf32>
    %59 = vector.shape_cast %58 : vector<1x8x32xf32> to vector<8x32xf32>
    %60 = vector.shape_cast %56 : vector<8x32xf32> to vector<1x8x32xf32>
    tpu.vector_store %arg3[%57, %c0_17, %c0_18], %60 {strides = array<i32>} : memref<4x8x32xf32, #tpu.memory_space<vmem>>, vector<1x8x32xf32>,
    %c2_i32 = arith.constant 2 : i32
    %c8_i32_19 = arith.constant 8 : i32
    %61 = arith.muli %c2_i32, %c8_i32_19 : i32
    %62 = tpu.assume_multiple %61, 8 : i32
    %63 = arith.index_cast %62 : i32 to index
    %c0_20 = arith.constant 0 : index
    %64 = vector.load %arg1[%63, %c0_20] : memref<32x128xf32, #tpu.memory_space<vmem>>, vector<8x128xf32>
    %cst_21 = arith.constant dense<0.000000e+00> : vector<8x128xf32>
    %65 = tpu.matmul %56, %3, %cst_21 {dimension_numbers = #tpu.dot_dimension_numbers<[1], [0], [0], [1], [0, 0, 1, 1], [], []>} : vector<8x32xf32>, vector<32x128xf32>, vector<8x128xf32> -> vector<8x128xf32>
    %66 = arith.addf %64, %65 : vector<8x128xf32>
    %67 = arith.mulf %66, %9 : vector<8x128xf32>
    %68 = math.tanh %67 : vector<8x128xf32>
    %69 = arith.mulf %68, %9 : vector<8x128xf32>
    %70 = arith.addf %69, %12 : vector<8x128xf32>
    %71 = vector.extract_strided_slice %70 {offsets = [0, 0], sizes = [8, 32], strides = [1, 1]} : vector<8x128xf32> to vector<8x32xf32>
    %72 = vector.extract_strided_slice %70 {offsets = [0, 32], sizes = [8, 32], strides = [1, 1]} : vector<8x128xf32> to vector<8x32xf32>
    %73 = vector.extract_strided_slice %70 {offsets = [0, 64], sizes = [8, 32], strides = [1, 1]} : vector<8x128xf32> to vector<8x32xf32>
    %74 = vector.extract_strided_slice %70 {offsets = [0, 96], sizes = [8, 32], strides = [1, 1]} : vector<8x128xf32> to vector<8x32xf32>
    %75 = arith.mulf %72, %54 : vector<8x32xf32>
    %76 = arith.mulf %71, %74 : vector<8x32xf32>
    %77 = arith.addf %75, %76 : vector<8x32xf32>
    %78 = math.tanh %77 : vector<8x32xf32>
    %79 = arith.mulf %73, %78 : vector<8x32xf32>
    %80 = arith.index_cast %c2_i32 : i32 to index
    %c0_22 = arith.constant 0 : index
    %c0_23 = arith.constant 0 : index
    %81 = vector.load %arg3[%80, %c0_22, %c0_23] : memref<4x8x32xf32, #tpu.memory_space<vmem>>, vector<1x8x32xf32>
    %82 = vector.shape_cast %81 : vector<1x8x32xf32> to vector<8x32xf32>
    %83 = vector.shape_cast %79 : vector<8x32xf32> to vector<1x8x32xf32>
    tpu.vector_store %arg3[%80, %c0_22, %c0_23], %83 {strides = array<i32>} : memref<4x8x32xf32, #tpu.memory_space<vmem>>, vector<1x8x32xf32>,
    %c3_i32 = arith.constant 3 : i32
    %c8_i32_24 = arith.constant 8 : i32
    %84 = arith.muli %c3_i32, %c8_i32_24 : i32
    %85 = tpu.assume_multiple %84, 8 : i32
    %86 = arith.index_cast %85 : i32 to index
    %c0_25 = arith.constant 0 : index
    %87 = vector.load %arg1[%86, %c0_25] : memref<32x128xf32, #tpu.memory_space<vmem>>, vector<8x128xf32>
    %cst_26 = arith.constant dense<0.000000e+00> : vector<8x128xf32>
    %88 = tpu.matmul %79, %3, %cst_26 {dimension_numbers = #tpu.dot_dimension_numbers<[1], [0], [0], [1], [0, 0, 1, 1], [], []>} : vector<8x32xf32>, vector<32x128xf32>, vector<8x128xf32> -> vector<8x128xf32>
    %89 = arith.addf %87, %88 : vector<8x128xf32>
    %90 = arith.mulf %89, %9 : vector<8x128xf32>
    %91 = math.tanh %90 : vector<8x128xf32>
    %92 = arith.mulf %91, %9 : vector<8x128xf32>
    %93 = arith.addf %92, %12 : vector<8x128xf32>
    %94 = vector.extract_strided_slice %93 {offsets = [0, 0], sizes = [8, 32], strides = [1, 1]} : vector<8x128xf32> to vector<8x32xf32>
    %95 = vector.extract_strided_slice %93 {offsets = [0, 32], sizes = [8, 32], strides = [1, 1]} : vector<8x128xf32> to vector<8x32xf32>
    %96 = vector.extract_strided_slice %93 {offsets = [0, 64], sizes = [8, 32], strides = [1, 1]} : vector<8x128xf32> to vector<8x32xf32>
    %97 = vector.extract_strided_slice %93 {offsets = [0, 96], sizes = [8, 32], strides = [1, 1]} : vector<8x128xf32> to vector<8x32xf32>
    %98 = arith.mulf %95, %77 : vector<8x32xf32>
    %99 = arith.mulf %94, %97 : vector<8x32xf32>
    %100 = arith.addf %98, %99 : vector<8x32xf32>
    %101 = math.tanh %100 : vector<8x32xf32>
    %102 = arith.mulf %96, %101 : vector<8x32xf32>
    %103 = arith.index_cast %c3_i32 : i32 to index
    %c0_27 = arith.constant 0 : index
    %c0_28 = arith.constant 0 : index
    %104 = vector.load %arg3[%103, %c0_27, %c0_28] : memref<4x8x32xf32, #tpu.memory_space<vmem>>, vector<1x8x32xf32>
    %105 = vector.shape_cast %104 : vector<1x8x32xf32> to vector<8x32xf32>
    %106 = vector.shape_cast %102 : vector<8x32xf32> to vector<1x8x32xf32>
    tpu.vector_store %arg3[%103, %c0_27, %c0_28], %106 {strides = array<i32>} : memref<4x8x32xf32, #tpu.memory_space<vmem>>, vector<1x8x32xf32>,
    %c4_i32 = arith.constant 4 : i32
    %c0_29 = arith.constant 0 : index
    %c0_30 = arith.constant 0 : index
    %107 = vector.load %arg6[%c0_29, %c0_30] : memref<8x32xf32, #tpu.memory_space<vmem>>, vector<8x32xf32>
    tpu.vector_store %arg6[%c0_29, %c0_30], %102 {strides = array<i32>} : memref<8x32xf32, #tpu.memory_space<vmem>>, vector<8x32xf32>,
    %c0_31 = arith.constant 0 : index
    %c0_32 = arith.constant 0 : index
    %108 = vector.load %arg7[%c0_31, %c0_32] : memref<8x32xf32, #tpu.memory_space<vmem>>, vector<8x32xf32>
    tpu.vector_store %arg7[%c0_31, %c0_32], %100 {strides = array<i32>} : memref<8x32xf32, #tpu.memory_space<vmem>>, vector<8x32xf32>,
    %c1_i32_33 = arith.constant 1 : i32
    %109 = arith.cmpi eq, %arg0, %c1_i32_33 : i32
    %110 = arith.extui %109 : i1 to i32
    %c0_i32_34 = arith.constant 0 : i32
    %111 = arith.cmpi ne, %110, %c0_i32_34 : i32
    scf.if %111 {
      %c0_35 = arith.constant 0 : index
      %c0_36 = arith.constant 0 : index
      %112 = vector.load %arg4[%c0_35, %c0_36] : memref<8x32xf32, #tpu.memory_space<vmem>>, vector<8x32xf32>
      tpu.vector_store %arg4[%c0_35, %c0_36], %102 {strides = array<i32>} : memref<8x32xf32, #tpu.memory_space<vmem>>, vector<8x32xf32>,
      %c0_37 = arith.constant 0 : index
      %c0_38 = arith.constant 0 : index
      %113 = vector.load %arg5[%c0_37, %c0_38] : memref<8x32xf32, #tpu.memory_space<vmem>>, vector<8x32xf32>
      tpu.vector_store %arg5[%c0_37, %c0_38], %100 {strides = array<i32>} : memref<8x32xf32, #tpu.memory_space<vmem>>, vector<8x32xf32>,
    } else {
    }
    return
  }
  func.func @transform_0(%arg0: i32) -> (i32, i32) {
    %c0_i32 = arith.constant 0 : i32
    %c0_i32_0 = arith.constant 0 : i32
    return %arg0, %c0_i32 : i32, i32
  }
  func.func @transform_1(%arg0: i32) -> (i32, i32) {
    %c0_i32 = arith.constant 0 : i32
    %c0_i32_0 = arith.constant 0 : i32
    %c0_i32_1 = arith.constant 0 : i32
    return %c0_i32, %c0_i32_0 : i32, i32
  }
  func.func @transform_2(%arg0: i32) -> (i32, i32, i32) {
    %c0_i32 = arith.constant 0 : i32
    %c0_i32_0 = arith.constant 0 : i32
    %c0_i32_1 = arith.constant 0 : i32
    return %arg0, %c0_i32, %c0_i32_0 : i32, i32, i32
  }
  func.func @transform_3(%arg0: i32) -> (i32, i32) {
    %c0_i32 = arith.constant 0 : i32
    %c0_i32_0 = arith.constant 0 : i32
    %c0_i32_1 = arith.constant 0 : i32
    return %c0_i32, %c0_i32_0 : i32, i32
  }
  func.func @transform_4(%arg0: i32) -> (i32, i32) {
    %c0_i32 = arith.constant 0 : i32
    %c0_i32_0 = arith.constant 0 : i32
    %c0_i32_1 = arith.constant 0 : i32
    return %c0_i32, %c0_i32_0 : i32, i32
  }
}

</mosaic_0001>

<bundles_post_ra>
// kernel: lstm_scratch_forward.3
= control target key start
LH: loop header
LB: loop body
LE: loop exit
PB: predicated region body
PF: predicated region fallthrough
CT: control target
= control target key end

     0   :  { %10 = vsyncpa [#allocation5], 0  ;;  %s1084_s0 = inlined_call_operand.vmem [shape: f32[64,128], index: 0, kind: input, shape index: {}]   ;;  %s1085_s1 = inlined_call_operand.hbm [shape: f32[32,128], index: 1, kind: input, shape index: {}]   ;;  %s1086_s2 = inlined_call_operand.hbm [shape: f32[8,8,32], index: 2, kind: output, shape index: {0}]   ;;  %s1087_s3 = inlined_call_operand.hbm [shape: f32[8,32], index: 3, kind: output, shape index: {1}]   ;;  %s1088_s4 = inlined_call_operand.hbm [shape: f32[8,32], index: 4, kind: output, shape index: {2}]  }
   0x1   :  { %11 = vsyncpa [#allocation6], 0 }
   0x2   :  { %13 = vsyncpa [#allocation6 + $0x1], 0 }
   0x3   :  { %14 = vsyncpa [#allocation9], 0  ;;  %s908_s15 = smov 0   ;;  %s910_s16 = smov 0  }
   0x4   :  { %s912_s17 = smov 0   ;;  %s914_s18 = smov 0  }
   0x5 LB: > { %s929_s19 = sadd.s32 4294967295, %s868_s18   ;;  %s591_s20 = sadd.s32 4294967294, %s868_s18   ;;  %s868_s18 = sphi %s914_s18, %s1094_s18   ;;  %s864_s17 = sphi %s912_s17, %s1093_s17   ;;  %s860_s16 = sphi %s910_s16, %s1092_s16   ;;  %s856_s15 = sphi %s908_s15, %s1091_s15  }
   0x6   : > { %s933_s21 = sadd.s32 1, %s868_s18   ;;  %s74_s22 = sadd.s32 1, %s864_s17 }
   0x7   : > { %s71_s23 = ssub.s32 %s868_s18, %s933_s21  ;;  %p84_p0 = scmp.ne.s32.totalorder %s864_s17, %s860_s16 }
   0x8   : > { %p72_p1 = scmp.eq.s32.totalorder %s71_s23, 0  ;;  %p85_p2 = scmp.eq.s32.totalorder %s929_s19, 1 }
   0x9   : > { %p90_p3 = scmp.ne.s32.totalorder %s860_s16, %s856_s15  ;;  %p91_p4 = scmp.eq.s32.totalorder %s591_s20, 1 }
   0xa   : > { %s944_s24 = scalar_select %p72_p1, %s864_s17, %s74_s22  }
   0xb   : > { %p948_p5 = por %p85_p2, %p84_p0  ;;  %p952_p6 = por %p91_p4, %p90_p3 }
   0xc   : > { %p592_p7 = scmp.ge.s32.totalorder %s868_s18, 1  ;;  %p140_p8 = scmp.lt.s32.totalorder %s868_s18, 3 }
   0xd   : > { %p593_p9 = scmp.ne.s32.totalorder %s929_s19, 0  ;;  %p644_p10 = scmp.eq.s32.totalorder %s929_s19, 0 }
   0xe   : > { %p141_p11 = pnand %p592_p7, %p140_p8  ;;  %s151_s29 = sshll.u32 %s1085_s1, 4  ;;  %s152_s29 = int_to_ptr.hbm [resolvable:$true] %s151_s29 }
   0xf   : > { %s870_s30 = smov [#allocation4]   ;;  %s871_s6 = smov 128  }
  0x10   : > { %p636_p12 = pneg %p141_p11  ;;  %s153_s5 = sshll.u32 %s870_s30, 4  ;;  %s154_s5 = int_to_ptr.vmem [resolvable:$true] %s153_s5 }
  0x11   : > { %s872_s7 = smov 8   ;;  %178 = sbr.rel (%p141_p11) target bundleno = 2416 (0x970), region = 28 }
  0x12   : > { %p637_p13 = pnand %p644_p10, %p636_p12 }
  0x14   : > { %639 = dma.hbm_to_vmem [thread:$0]  (!%p637_p13), %s152_s29, 512, %s154_s5, [#allocation5], %s871_s6, %s871_s6, %s872_s7  }
  0x16   : > { %843 = dma.done.wait (%p644_p10), [#allocation5], 512  }
  0x17   : > { %845 = vsyncadd (%p644_p10), [#allocation5], 4294966784  ;;  %s198_s8 = sand.u32 1, %s860_s16   ;;  %s598_s9 = sshll.u32 %s929_s19, 2 }
  0x18   : > { %s597_s10 = sshll.u32 %s198_s8, 5  ;;  %p206_p0 = scmp.lt.s32.totalorder %s598_s9, 7 }
  0x19   : > { %s978_s20 = scalar_lea.vmem [#allocation7], %s597_s10  ;;  %215 = sbr.rel (%p593_p9) target bundleno = 33 (0x21), region = 36 }
  0x1a   : > { %s1096_s9 = smov (!%p206_p0, %s598_s9), 7 }
  0x1b   : > { %s599_s11 = sshll.u32 %s1096_s9, 3 }
  0x1c   : > { %s976_s14 = scalar_lea.vmem %s1084_s0, %s599_s11 }
  0x1e   : > { %vm216_vm0 = vcmask 261120   ;;  %v873_v0 = vmov 0.0  }
  0x1f   : > { %217 = vst.msk [vmem:[#allocation2] sm:$0xff] %vm216_vm0, %v873_v0 }
  0x20   : > { %218 = vst.msk [vmem:[#allocation3] sm:$0xff] %vm216_vm0, %v873_v0 }
  0x21 PF: > { %v222_v1 = vld [vmem:[#allocation4 + $0x18] sm:$0xff]  ;;  %v221_v2 = vld [vmem:[#allocation4 + $0x10] sm:$0xff]  ;;  %v220_v3 = vld [vmem:[#allocation4 + $0x8] sm:$0xff]  ;;  %vm231_vm1 = vcmask 261120   ;;  %v223_v6 = vlaneseq  ;;  %v874_v9 = vmov 1.0   ;;  %v875_v15 = vmov 0.0  }
  0x22   : > { %247 = vmatpush.msra.mxu0 %v222_v1  ;;  %302 = vmatpush.msra.mxu1 %v222_v1  ;;  %v219_v4 = vld [vmem:[#allocation4] sm:$0xff]  ;;  %v230_v8 = vld [vmem:[%s976_s14] sm:$0xff]  ;;  %s876_s22 = smov 32   ;;  %s877_s23 = smov 64   ;;  %v602_v30 = vld [vmem:[%s976_s14 + $0x8] sm:$0xff] }
  0x23   : > { %354 = vmatpush.msra.mxu2 %v222_v1  ;;  %406 = vmatpush.msra.mxu3 %v222_v1  ;;  %v224_v7 = vand.u32 127, %v223_v6  ;;  %v605_v46 = vld [vmem:[%s976_s14 + $0x10] sm:$0xff]  ;;  %v608_v62 = vld [vmem:[%s976_s14 + $0x18] sm:$0xff]  ;;  %s878_s27 = smov 96   ;;  %p611_p1 = scmp.ne.s32.totalorder %s929_s19, 1 }
  0x24   : > { %248 = vmatpush.msra.mxu0 %v221_v2  ;;  %303 = vmatpush.msra.mxu1 %v221_v2 }
  0x25   : > { %355 = vmatpush.msra.mxu2 %v221_v2  ;;  %407 = vmatpush.msra.mxu3 %v221_v2  ;;  %vm225_vm2 = vcmp.lt.s32.totalorder %v224_v7, 96 }
  0x26   : > { %249 = vmatpush.msra.mxu0 %v220_v3  ;;  %v228_v5 = vld [vmem:[#allocation2] sm:$0xff]  ;;  %304 = vmatpush.msra.mxu1 %v220_v3  ;;  %v984_v10 = vsel %vm225_vm2, 0.5, %v874_v9  ;;  %v987_v16 = vsel %vm225_vm2, 0.5, %v875_v15 }
  0x27   : > { %356 = vmatpush.msra.mxu2 %v220_v3  ;;  %408 = vmatpush.msra.mxu3 %v220_v3  ;;  %v229_v19 = vld [vmem:[#allocation3] sm:$0xff] }
  0x28   : > { %250 = vmatpush.msra.mxu0 %v219_v4  ;;  %305 = vmatpush.msra.mxu1 %v219_v4 }
  0x29   : > { %601 = vmatmul.msk.f32.vlgmr.msra.gmra.mxu0 %vm231_vm1, %v228_v5  ;;  %357 = vmatpush.msra.mxu2 %v219_v4 }
  0x2a   : > { %409 = vmatpush.msra.mxu3 %v219_v4 }
  0xa6   : > { %v252_v11 = vpop.f32.mrf.mxu0 }
  0xa7   : > { %v255_v12 = vadd.f32 %v252_v11, %v230_v8 }
  0xa9   : > { %v256_v13 = vmul.f32 %v255_v12, %v984_v10 }
  0xab   : > { %696 = vtanh.f32 %v256_v13 }
  0xb1   : > { %v697_v14 = vpop.eup %696 }
  0xb2   : > { %v258_v17 = vmul.f32 %v697_v14, %v984_v10 }
  0xb4   : > { %v259_v18 = vadd.f32 %v258_v17, %v987_v16 }
  0xb6   : > { %266 = vrot.lane.b32.xlu0 %v259_v18, %s876_s22 }
  0xbe   : > { %261 = vrot.lane.b32.xlu0 %v229_v19, %s876_s22 }
 0x128   : > { %v267_v20 = vpop.permute.xlu0 %266 }
 0x129   : > { %v269_v21 = vmul.f32 %v267_v20, %v259_v18 }
 0x12b   : > { %271 = vrot.lane.b32.xlu1 %v269_v21, %s876_s22 }
 0x130   : > { %v262_v22 = vpop.permute.xlu0 %261 }
 0x131   : > { %v264_v23 = vmul.f32 %v262_v22, %v259_v18 }
 0x19d   : > { %v272_v24 = vpop.permute.xlu1 %271 }
 0x19e   : > { %v274_v25 = vadd.f32 %v272_v24, %v264_v23 }
 0x1a0   : > { %698 = vtanh.f32 %v274_v25 }
 0x1a6   : > { %v699_v26 = vpop.eup %698 }
 0x1a7   : > { %277 = vrot.lane.b32.xlu1 %v699_v26, %s876_s22 }
 0x219   : > { %v278_v27 = vpop.permute.xlu1 %277 }
 0x21a   : > { %v280_v28 = vmul.f32 %v278_v27, %v259_v18 }
 0x21c   : > { %282 = vrot.lane.b32.xlu2 %v280_v28, %s877_s23 }
 0x276   : > { %v283_v29 = vpop.permute.xlu2 %282 }
 0x277   : > { %285 = vst.msk [vmem:[%s978_s20] sm:$0xff] %vm231_vm1, %v283_v29  ;;  %603 = vmatmul.msk.f32.vlgmr.msra.gmra.mxu1 %vm231_vm1, %v283_v29 }
 0x2f4   : > { %v307_v31 = vpop.f32.mrf.mxu1 }
 0x2f5   : > { %v310_v32 = vadd.f32 %v602_v30, %v307_v31 }
 0x2f7   : > { %v311_v33 = vmul.f32 %v310_v32, %v984_v10 }
 0x2f9   : > { %700 = vtanh.f32 %v311_v33 }
 0x2ff   : > { %v701_v34 = vpop.eup %700 }
 0x300   : > { %v313_v35 = vmul.f32 %v701_v34, %v984_v10 }
 0x302   : > { %v314_v36 = vadd.f32 %v313_v35, %v987_v16 }
 0x304   : > { %317 = vrot.lane.b32.xlu2 %v314_v36, %s876_s22  ;;  %v315_v39 = vmul.f32 %v314_v36, %v274_v25 }
 0x35e   : > { %v318_v37 = vpop.permute.xlu2 %317 }
 0x35f   : > { %v320_v38 = vmul.f32 %v318_v37, %v314_v36 }
 0x361   : > { %322 = vrot.lane.b32.xlu0 %v320_v38, %s876_s22 }
 0x3d3   : > { %v323_v40 = vpop.permute.xlu0 %322 }
 0x3d4   : > { %v325_v41 = vadd.f32 %v323_v40, %v315_v39 }
 0x3d6   : > { %702 = vtanh.f32 %v325_v41 }
 0x3dc   : > { %v703_v42 = vpop.eup %702 }
 0x3dd   : > { %328 = vrot.lane.b32.xlu1 %v703_v42, %s876_s22 }
 0x44f   : > { %v329_v43 = vpop.permute.xlu1 %328 }
 0x450   : > { %v331_v44 = vmul.f32 %v329_v43, %v314_v36 }
 0x452   : > { %333 = vrot.lane.b32.xlu2 %v331_v44, %s877_s23 }
 0x4ac   : > { %v334_v45 = vpop.permute.xlu2 %333 }
 0x4ad   : > { %604 = vst.msk [vmem:[%s978_s20 + $0x8] sm:$0xff] %vm231_vm1, %v334_v45  ;;  %606 = vmatmul.msk.f32.vlgmr.msra.gmra.mxu2 %vm231_vm1, %v334_v45 }
 0x530   : > { %v359_v47 = vpop.f32.mrf.mxu2 }
 0x531   : > { %v362_v48 = vadd.f32 %v605_v46, %v359_v47 }
 0x533   : > { %v363_v49 = vmul.f32 %v362_v48, %v984_v10 }
 0x535   : > { %704 = vtanh.f32 %v363_v49 }
 0x53b   : > { %v705_v50 = vpop.eup %704 }
 0x53c   : > { %v365_v51 = vmul.f32 %v705_v50, %v984_v10 }
 0x53e   : > { %v366_v52 = vadd.f32 %v365_v51, %v987_v16 }
 0x540   : > { %369 = vrot.lane.b32.xlu0 %v366_v52, %s876_s22  ;;  %v367_v55 = vmul.f32 %v366_v52, %v325_v41 }
 0x5b2   : > { %v370_v53 = vpop.permute.xlu0 %369 }
 0x5b3   : > { %v372_v54 = vmul.f32 %v370_v53, %v366_v52 }
 0x5b5   : > { %374 = vrot.lane.b32.xlu1 %v372_v54, %s876_s22 }
 0x627   : > { %v375_v56 = vpop.permute.xlu1 %374 }
 0x628   : > { %v377_v57 = vadd.f32 %v375_v56, %v367_v55 }
 0x62a   : > { %706 = vtanh.f32 %v377_v57 }
 0x630   : > { %v707_v58 = vpop.eup %706 }
 0x631   : > { %380 = vrot.lane.b32.xlu2 %v707_v58, %s876_s22 }
 0x68b   : > { %v381_v59 = vpop.permute.xlu2 %380 }
 0x68c   : > { %v383_v60 = vmul.f32 %v381_v59, %v366_v52 }
 0x68e   : > { %385 = vrot.lane.b32.xlu0 %v383_v60, %s877_s23 }
 0x700   : > { %v386_v61 = vpop.permute.xlu0 %385 }
 0x701   : > { %607 = vst.msk [vmem:[%s978_s20 + $0x10] sm:$0xff] %vm231_vm1, %v386_v61  ;;  %609 = vmatmul.msk.f32.vlgmr.msra.gmra.mxu3 %vm231_vm1, %v386_v61 }
 0x784   : > { %v411_v63 = vpop.f32.mrf.mxu3 }
 0x785   : > { %v414_v0 = vadd.f32 %v608_v62, %v411_v63 }
 0x787   : > { %v415_v1 = vmul.f32 %v414_v0, %v984_v10 }
 0x789   : > { %708 = vtanh.f32 %v415_v1 }
 0x78f   : > { %v709_v2 = vpop.eup %708 }
 0x790   : > { %v417_v3 = vmul.f32 %v709_v2, %v984_v10 }
 0x792   : > { %v418_v4 = vadd.f32 %v417_v3, %v987_v16 }
 0x794   : > { %421 = vrot.lane.b32.xlu1 %v418_v4, %s876_s22  ;;  %v419_v7 = vmul.f32 %v418_v4, %v377_v57 }
 0x806   : > { %v422_v5 = vpop.permute.xlu1 %421 }
 0x807   : > { %v424_v6 = vmul.f32 %v422_v5, %v418_v4 }
 0x809   : > { %426 = vrot.lane.b32.xlu2 %v424_v6, %s876_s22 }
 0x863   : > { %v427_v8 = vpop.permute.xlu2 %426 }
 0x864   : > { %v429_v9 = vadd.f32 %v427_v8, %v419_v7 }
 0x866   : > { %710 = vtanh.f32 %v429_v9  ;;  %444 = vrot.lane.b32.xlu2 %v429_v9, %s878_s27 }
 0x86c   : > { %v711_v11 = vpop.eup %710 }
 0x86d   : > { %432 = vrot.lane.b32.xlu0 %v711_v11, %s876_s22 }
 0x8c0   : > { %v445_v12 = vpop.permute.xlu2 %444 }
 0x8c1   : > { %447 = vst.msk [vmem:[#allocation3] sm:$0xff] %vm231_vm1, %v445_v12 }
 0x8df   : > { %v433_v10 = vpop.permute.xlu0 %432 }
 0x8e0   : > { %v435_v13 = vmul.f32 %v433_v10, %v418_v4 }
 0x8e2   : > { %437 = vrot.lane.b32.xlu1 %v435_v13, %s877_s23 }
 0x952   : > { %451 = sbr.rel (%p611_p1) target bundleno = 2393 (0x959), region = 40 }
 0x954   : > { %v438_v14 = vpop.permute.xlu1 %437 }
 0x955   : > { %610 = vst.msk [vmem:[%s978_s20 + $0x18] sm:$0xff] %vm231_vm1, %v438_v14 }
 0x956   : > { %442 = vst.msk [vmem:[#allocation2] sm:$0xff] %vm231_vm1, %v438_v14 }
 0x957   : > { %452 = vst.msk [vmem:[#allocation8] sm:$0xff] %vm231_vm1, %v438_v14 }
 0x958   : > { %453 = vst.msk [vmem:[#allocation10] sm:$0xff] %vm231_vm1, %v445_v12 }
 0x959 PF: > { %s484_s30 = sshll.u32 %s1087_s3, 4  ;;  %s879_s5 = smov [#allocation8]   ;;  %s485_s30 = int_to_ptr.hbm [resolvable:$true] %s484_s30 }
 0x95a   : > { %s482_s6 = sshll.u32 %s879_s5, 4  ;;  %s621_s7 = sshll.u32 %s929_s19, 5  ;;  %s483_s6 = int_to_ptr.vmem [resolvable:$true] %s482_s6 }
 0x95b   : > { %628 = dma.vmem_to_hbm [thread:$0]  (%p85_p2), %s483_s6, 128, %s485_s30, [#allocation9]  }
 0x95c   : > { %s467_s9 = sshll.u32 %s978_s20, 4  ;;  %s466_s12 = scalar_lea.hbm %s1086_s2, %s621_s7  ;;  %s468_s9 = int_to_ptr.vmem [resolvable:$true] %s467_s9 }
 0x95d   : > { %s469_s13 = sshll.u32 %s466_s12, 4  ;;  %s455_s14 = scalar_lea.sflag [#allocation6], %s198_s8  ;;  %s470_s13 = int_to_ptr.hbm [resolvable:$true] %s469_s13 }
 0x95e   : > { %s784_s22 = sshra.s32 %s470_s13, 4  ;;  %s790_s20 = scalar_lea.hbm %s1086_s2, 64  ;;  %s785_s22 = int_to_ptr.hbm [resolvable:$true] %s784_s22 }
 0x95f   : > { %s786_s23 = scalar_lea.hbm %s785_s22, 32  ;;  %p791_p8 = scmp.lt.s32.totalorder %s785_s22, %s1086_s2 }
 0x960   : > { %p787_p3 = scmp.ne.s32.totalorder %s785_s22, %s786_s23  ;;  %p792_p9 = scmp.lt.s32.totalorder %s790_s20, %s786_s23 }
 0x962   : > { %p788_p4 = pnand %p787_p3, %p948_p5  ;;  %p793_p10 = por %p792_p9, %p791_p8 }
 0x964   : > { %p789_p7 = pneg %p788_p4 }
 0x966   : > { %p794_p11 = pnand %p793_p10, %p789_p7 }
 0x968   : > { %797 = shalt.err (!%p794_p11)
}
 0x969   : > { %s880_s8 = smov 128   ;;  %s881_s5 = smov 8  }
 0x96a   : > { %626 = dma.vmem_to_hbm [thread:$0]  (%p948_p5), %s468_s9, 512, %s470_s13, %s455_s14, %s880_s8, %s880_s8, %s881_s5  }
 0x96b   : > { %s496_s10 = sshll.u32 %s1088_s4, 4  ;;  %s882_s11 = smov [#allocation10]   ;;  %s497_s10 = int_to_ptr.hbm [resolvable:$true] %s496_s10 }
 0x96c   : > { %s494_s12 = sshll.u32 %s882_s11, 4  ;;  %s495_s12 = int_to_ptr.vmem [resolvable:$true] %s494_s12 }
 0x96d   : > { %630 = dma.vmem_to_hbm [thread:$0]  (%p85_p2), %s495_s12, 128, %s497_s10, [#allocation9]  }
 0x96e   : > { %847 = dma.done.wait (%p85_p2), [#allocation9], 256  }
 0x96f   : > { %849 = vsyncadd (%p85_p2), [#allocation9], 4294967040 }
 0x970 PF: > { %p650_p5 = scmp.ge.s32.totalorder %s868_s18, 2  ;;  %s518_s25 = sand.u32 1, %s856_s15  }
 0x971   : > { %s519_s9 = scalar_lea.sflag [#allocation6], %s518_s25 }
 0x972   : > { %p641_p12 = pnand %p650_p5, %p952_p6 }
 0x974   : > { %p642_p13 = pneg %p641_p12 }
 0x976   : > { %851 = dma.done.wait (%p642_p13), %s519_s9, 512  }
 0x977   : > { %853 = vsyncadd (%p642_p13), %s519_s9, 4294966784  ;;  %p17_p0 = scmp.ge.s32.totalorder %s933_s21, 4   ;;  %s1091_s15 = smov %s860_s16 }
 0x978   : > { %s1092_s16 = smov %s864_s17  ;;  %s1093_s17 = smov %s944_s24 }
 0x979   : > { %s1094_s18 = smov %s933_s21  ;;  %19 = sbr.rel (!%p17_p0) target bundleno = 5 (0x5), region = 98 }
 0x97e   :  { %525 = vsyncpa [#allocation5], 1 }
 0x97f   :  { %527 = vsyncpa [#allocation5 + $0x1], 1 }
 0x980   :  { %528 = vsyncpa [#allocation6], 1 }
 0x981   :  { %530 = vsyncpa [#allocation6 + $0x1], 1 }
 0x982   :  { %531 = vsyncpa [#allocation9], 1 }

// kernel: lstm_scratch_forward.2
= control target key start
LH: loop header
LB: loop body
LE: loop exit
PB: predicated region body
PF: predicated region fallthrough
CT: control target
= control target key end

     0   :  { %8 = vsyncpa [#allocation3], 0  ;;  %s284_s0 = inlined_call_operand.hbm [shape: f32[64,32], index: 0, kind: input, shape index: {}]   ;;  %s285_s1 = inlined_call_operand.hbm [shape: f32[32,128], index: 1, kind: input, shape index: {}]   ;;  %s286_s2 = inlined_call_operand.vmem [shape: f32[1,128], index: 2, kind: input, shape index: {}]   ;;  %s287_s3 = inlined_call_operand.vmem [shape: f32[64,128], index: 3, kind: output, shape index: {}]  }
   0x1   :  { %s14_s14 = sshll.u32 %s284_s0, 4  ;;  %s15_s14 = int_to_ptr.hbm [resolvable:$true] %s14_s14 }
   0x2   :  { %9 = vsyncpa [#allocation5], 0  ;;  %s219_s15 = smov [#allocation2]   ;;  %s27_s19 = sshll.u32 %s285_s1, 4  ;;  %s28_s19 = int_to_ptr.hbm [resolvable:$true] %s27_s19 }
   0x3   :  { %s16_s16 = sshll.u32 %s219_s15, 4  ;;  %s220_s20 = smov 128   ;;  %s17_s16 = int_to_ptr.vmem [resolvable:$true] %s16_s16 }
   0x4   :  { %s221_s21 = smov 8   ;;  %s222_s22 = smov [#allocation4]  }
   0x5   :  { %22 = dma.hbm_to_vmem [thread:$0]  %s15_s14, 1024, %s17_s16, [#allocation3], %s220_s20, %s220_s20, %s221_s21  }
   0x6   :  { %s29_s23 = sshll.u32 %s222_s22, 4  ;;  %s30_s23 = int_to_ptr.vmem [resolvable:$true] %s29_s23 }
   0x7   :  { %35 = dma.hbm_to_vmem [thread:$0]  %s28_s19, 512, %s30_s23, [#allocation5], %s220_s20, %s220_s20, %s221_s21  }
   0x8   :  { %215 = dma.done.wait [#allocation3], 1024  }
   0x9   :  { %216 = vsyncadd [#allocation3], 4294966272 }
   0xa   :  { %217 = dma.done.wait [#allocation5], 512  }
   0xb   :  { %218 = vsyncadd [#allocation5], 4294966784  ;;  %v57_v0 = vld [vmem:[#allocation4 + $0x18] sm:$0xff]  ;;  %v56_v1 = vld [vmem:[#allocation4 + $0x10] sm:$0xff]  ;;  %vm62_vm0 = vcmask 261120  }
   0xc   :  { %151 = vmatpush.msra.mxu2 %v57_v0  ;;  %152 = vmatpush.msra.mxu3 %v57_v0  ;;  %v55_v2 = vld [vmem:[#allocation4 + $0x8] sm:$0xff]  ;;  %v54_v3 = vld [vmem:[#allocation4] sm:$0xff]  ;;  %v52_v5 = vld [vmem:[#allocation2 + $0x30] sm:$0xff] }
   0xd   :  { %99 = vmatpush.msra.mxu0 %v57_v0  ;;  %150 = vmatpush.msra.mxu1 %v57_v0  ;;  %v50_v4 = vld [vmem:[#allocation2 + $0x20] sm:$0xff]  ;;  %v48_v7 = vld [vmem:[#allocation2 + $0x10] sm:$0xff]  ;;  %v51_v8 = vld [vmem:[#allocation2 + $0x28] sm:$0xff] }
   0xe   :  { %154 = vmatpush.msra.mxu2 %v56_v1  ;;  %155 = vmatpush.msra.mxu3 %v56_v1  ;;  %v46_v6 = vld [vmem:[#allocation2] sm:$0xff]  ;;  %v53_v9 = vld [vmem:[#allocation2 + $0x38] sm:$0xff]  ;;  %v47_v10 = vld [vmem:[#allocation2 + $0x8] sm:$0xff] }
   0xf   :  { %100 = vmatpush.msra.mxu0 %v56_v1  ;;  %153 = vmatpush.msra.mxu1 %v56_v1  ;;  %v49_v11 = vld [vmem:[#allocation2 + $0x18] sm:$0xff]  ;;  %v166_v12 = vld [vmem:[%s286_s2] ss:$0 sm:$0xff] }
  0x10   :  { %157 = vmatpush.msra.mxu2 %v55_v2  ;;  %158 = vmatpush.msra.mxu3 %v55_v2 }
  0x11   :  { %101 = vmatpush.msra.mxu0 %v55_v2  ;;  %156 = vmatpush.msra.mxu1 %v55_v2 }
  0x12   :  { %160 = vmatpush.msra.mxu2 %v54_v3  ;;  %161 = vmatpush.msra.mxu3 %v54_v3 }
  0x13   :  { %146 = vmatmul.msk.f32.vlgmr.msra.gmra.mxu2 %vm62_vm0, %v50_v4  ;;  %148 = vmatmul.msk.f32.vlgmr.msra.gmra.mxu3 %vm62_vm0, %v52_v5 }
  0x14   :  { %102 = vmatpush.msra.mxu0 %v54_v3  ;;  %159 = vmatpush.msra.mxu1 %v54_v3 }
  0x15   :  { %142 = vmatmul.msk.f32.vlgmr.msra.gmra.mxu0 %vm62_vm0, %v46_v6  ;;  %144 = vmatmul.msk.f32.vlgmr.msra.gmra.mxu1 %vm62_vm0, %v48_v7 }
  0x1b   :  { %147 = vmatmul.msk.f32.gmra.mxu2 %vm62_vm0, %v51_v8  ;;  %149 = vmatmul.msk.f32.gmra.mxu3 %vm62_vm0, %v53_v9 }
  0x1d   :  { %143 = vmatmul.msk.f32.gmra.mxu0 %vm62_vm0, %v47_v10  ;;  %145 = vmatmul.msk.f32.gmra.mxu1 %vm62_vm0, %v49_v11 }
  0x92   :  { %v104_v13 = vpop.f32.mrf.mxu0  ;;  %v110_v14 = vpop.f32.mrf.mxu1 }
  0x93   :  { %v105_v15 = vadd.f32 %v166_v12, %v104_v13  ;;  %v111_v16 = vadd.f32 %v166_v12, %v110_v14 }
  0x95   :  { %128 = vst [vmem:[%s287_s3] sm:$0xff] %v105_v15 }
  0x96   :  { %130 = vst [vmem:[%s287_s3 + $0x10] sm:$0xff] %v111_v16  ;;  %v116_v17 = vpop.f32.mrf.mxu2  ;;  %v122_v18 = vpop.f32.mrf.mxu3 }
  0x97   :  { %v117_v19 = vadd.f32 %v166_v12, %v116_v17  ;;  %v123_v20 = vadd.f32 %v166_v12, %v122_v18 }
  0x99   :  { %132 = vst [vmem:[%s287_s3 + $0x20] sm:$0xff] %v117_v19 }
  0x9a   :  { %134 = vst [vmem:[%s287_s3 + $0x30] sm:$0xff] %v123_v20  ;;  %v107_v21 = vpop.f32.mrf.mxu0  ;;  %v113_v22 = vpop.f32.mrf.mxu1 }
  0x9b   :  { %v108_v23 = vadd.f32 %v166_v12, %v107_v21  ;;  %v114_v24 = vadd.f32 %v166_v12, %v113_v22 }
  0x9d   :  { %129 = vst [vmem:[%s287_s3 + $0x8] sm:$0xff] %v108_v23 }
  0x9e   :  { %131 = vst [vmem:[%s287_s3 + $0x18] sm:$0xff] %v114_v24  ;;  %v119_v25 = vpop.f32.mrf.mxu2  ;;  %v125_v26 = vpop.f32.mrf.mxu3 }
  0x9f   :  { %v120_v27 = vadd.f32 %v166_v12, %v119_v25  ;;  %v126_v28 = vadd.f32 %v166_v12, %v125_v26 }
  0xa1   :  { %133 = vst [vmem:[%s287_s3 + $0x28] sm:$0xff] %v120_v27 }
  0xa2   :  { %135 = vst [vmem:[%s287_s3 + $0x38] sm:$0xff] %v126_v28 }
  0xa3   :  { %140 = vsyncpa [#allocation3], 1 }
  0xa4   :  { %141 = vsyncpa [#allocation5], 1 }

</bundles_post_ra>
